<compile_context>
chip_gen: v6e
topology: v6e:2x2x1
jax: 0.10.0
libtpu: 0.0.40
codegen_flags: <defaults>
</compile_context>

<pallas_src>
import jax
import jax.numpy as jnp
import numpy as np
from jax import lax
from jax.experimental import pallas as pl
from jax.experimental.pallas import tpu as pltpu


def _clip8(x, bits=7):
    # clip8: conv[conv >= 2**bits - 1] = 2**bits - 1 ; conv[conv <= -2**bits] = -2**bits
    # == clamp to [-(2**bits), 2**bits - 1]
    return jnp.clip(x, float(-(2 ** bits)), float(2 ** bits - 1))


def attention_kernel(x_ref, wq_ref, bq_ref, wk_ref, bk_ref, wv_ref, bv_ref,
                     wo_ref, bo_ref,
                     q_out, k_out, v_out, s_out, c_out, o_out):
    x = x_ref[0]                       # (S, E)
    H = s_out.shape[1]
    P = q_out.shape[2] // H            # A = H * P

    # Fused (all-heads) QKV projections: (S, E) @ (E, A) -> (S, A), +bias, clip8.
    q = _clip8(jnp.dot(x, wq_ref[...], preferred_element_type=jnp.float32) + bq_ref[...])
    k = _clip8(jnp.dot(x, wk_ref[...], preferred_element_type=jnp.float32) + bk_ref[...])
    v = _clip8(jnp.dot(x, wv_ref[...], preferred_element_type=jnp.float32) + bv_ref[...])
    q_out[0] = q                       # lane-dense (S, A) stores
    k_out[0] = k
    v_out[0] = v

    # Per-head attention; H is tiny and static -> unrolled Python loop.
    ctx_heads = []
    for h in range(H):
        qh = q[:, h * P:(h + 1) * P]
        kh = k[:, h * P:(h + 1) * P]
        vh = v[:, h * P:(h + 1) * P]
        # scores = qh @ kh^T (no softmax in the reference module); contract the
        # last dims directly so no transpose is materialized.
        sh = _clip8(lax.dot_general(qh, kh, (((1,), (1,)), ((), ())),
                                    preferred_element_type=jnp.float32))
        s_out[0, h] = sh
        ctx_heads.append(_clip8(jnp.dot(sh, vh, preferred_element_type=jnp.float32)))

    ctx_flat = jnp.concatenate(ctx_heads, axis=-1)   # (S, A), lane-dense
    c_out[0] = ctx_flat

    # Single-pass output projection: (S, A) @ (A, E) + bias, clip8.
    o_out[0] = _clip8(jnp.dot(ctx_flat, wo_ref[...],
                              preferred_element_type=jnp.float32) + bo_ref[...])


def attention_forward(x, Wq, bq, Wk, bk, Wv, bv, Wo, bo, heads, proj):
    """Returns (query_layer, key_layer, value_layer, attention_scores,
    context_layer, attention_output), matching the PyTorch module."""
    B, S, E = x.shape
    H, P = heads, proj
    A = H * P

    bq_r = bq.reshape(1, A)
    bk_r = bk.reshape(1, A)
    bv_r = bv.reshape(1, A)
    bo_r = bo.reshape(1, E)

    x_spec = pl.BlockSpec((1, S, E), lambda b: (b, 0, 0))
    w_spec = pl.BlockSpec((E, A), lambda b: (0, 0))   # constant -> DMA'd once
    b_spec = pl.BlockSpec((1, A), lambda b: (0, 0))
    wo_spec = pl.BlockSpec((A, E), lambda b: (0, 0))
    bo_spec = pl.BlockSpec((1, E), lambda b: (0, 0))

    mixed_spec = pl.BlockSpec((1, S, A), lambda b: (b, 0, 0))
    score_spec = pl.BlockSpec((1, H, S, S), lambda b: (b, 0, 0, 0))
    o_spec = pl.BlockSpec((1, S, E), lambda b: (b, 0, 0))

    out_shapes = (
        jax.ShapeDtypeStruct((B, S, A), jnp.float32),   # mixed query (flat heads)
        jax.ShapeDtypeStruct((B, S, A), jnp.float32),   # mixed key
        jax.ShapeDtypeStruct((B, S, A), jnp.float32),   # mixed value
        jax.ShapeDtypeStruct((B, H, S, S), jnp.float32),  # attention_scores
        jax.ShapeDtypeStruct((B, S, A), jnp.float32),   # context_layer (flat)
        jax.ShapeDtypeStruct((B, S, E), jnp.float32),   # attention_output
    )

    mq, mk, mv, scores, ctx_flat, attn_out = pl.pallas_call(
        attention_kernel,
        grid_spec=pltpu.PrefetchScalarGridSpec(
            num_scalar_prefetch=0,
            grid=(B,),
            in_specs=[x_spec, w_spec, b_spec, w_spec, b_spec,
                      w_spec, b_spec, wo_spec, bo_spec],
            out_specs=[mixed_spec, mixed_spec, mixed_spec,
                       score_spec, mixed_spec, o_spec],
        ),
        out_shape=out_shapes,
        compiler_params=pltpu.CompilerParams(
            dimension_semantics=("parallel",)),
    )(x, Wq, bq_r, Wk, bk_r, Wv, bv_r, Wo, bo_r)

    # (B, H, S, P) head views are wrapper-side layout plumbing (no compute).
    def to_heads(z):
        return z.reshape(B, S, H, P).transpose(0, 2, 1, 3)

    return to_heads(mq), to_heads(mk), to_heads(mv), scores, ctx_flat, attn_out


def reference(x, Wq, bq, Wk, bk, Wv, bv, Wo, bo, H, P):
    B, S, E = x.shape
    with jax.default_matmul_precision("highest"):
        q = _clip8(x @ Wq + bq)
        k = _clip8(x @ Wk + bk)
        v = _clip8(x @ Wv + bv)

        def t(z):
            return z.reshape(B, S, H, P).transpose(0, 2, 1, 3)

        qh, kh, vh = t(q), t(k), t(v)
        scores = _clip8(jnp.einsum('bhsp,bhtp->bhst', qh, kh))
        ctx = _clip8(jnp.einsum('bhst,bhtp->bhsp', scores, vh))
        ctx_flat = ctx.transpose(0, 2, 1, 3).reshape(B, S, H * P)
        out = _clip8(ctx_flat @ Wo + bo)
    return qh, kh, vh, scores, ctx_flat, out


if __name__ == "__main__":
    # Module config: Attention(dim_seq=8, heads=2, projections=16, embedding=32)
    B, S, E = 2, 8, 32
    H, P = 2, 16
    A = H * P

    key = jax.random.PRNGKey(0)
    ks = jax.random.split(key, 9)
    x = jax.random.normal(ks[0], (B, S, E), jnp.float32) * 2.0  # exercises clip8
    Wq = jax.random.normal(ks[1], (E, A), jnp.float32)
    bq = jax.random.normal(ks[2], (A,), jnp.float32)
    Wk = jax.random.normal(ks[3], (E, A), jnp.float32)
    bk = jax.random.normal(ks[4], (A,), jnp.float32)
    Wv = jax.random.normal(ks[5], (E, A), jnp.float32)
    bv = jax.random.normal(ks[6], (A,), jnp.float32)
    Wo = jax.random.normal(ks[7], (A, E), jnp.float32)
    bo = jax.random.normal(ks[8], (E,), jnp.float32)

    outs = attention_forward(x, Wq, bq, Wk, bk, Wv, bv, Wo, bo, H, P)
    outs = jax.block_until_ready(outs)

    refs = reference(x, Wq, bq, Wk, bk, Wv, bv, Wo, bo, H, P)
    names = ["query_layer", "key_layer", "value_layer",
             "attention_scores", "context_layer", "attention_output"]
    # Tolerance note: clip8'd f32 matmuls with heavy cancellation amplify tiny
    # accumulation-order differences through scores -> context -> output, so a
    # small absolute slack is required. Values live in [-128, 127]; a real
    # structural bug produces O(10..100) errors, well outside this tolerance.
    for name, got, want in zip(names, outs, refs):
        assert got.shape == want.shape, (name, got.shape, want.shape)
        np.testing.assert_allclose(np.asarray(got), np.asarray(want),
                                   rtol=1e-2, atol=1e-1, err_msg=name)

    print("KERNEL_OK")
</pallas_src>

<mosaic_0001>
module attributes {stable_mosaic.version = 11 : i64} {
  func.func @attention_kernel(%arg0: i32, %arg1: memref<1x8x32xf32, #tpu.memory_space<vmem>>, %arg2: memref<32x32xf32, #tpu.memory_space<vmem>>, %arg3: memref<1x32xf32, #tpu.memory_space<vmem>>, %arg4: memref<32x32xf32, #tpu.memory_space<vmem>>, %arg5: memref<1x32xf32, #tpu.memory_space<vmem>>, %arg6: memref<32x32xf32, #tpu.memory_space<vmem>>, %arg7: memref<1x32xf32, #tpu.memory_space<vmem>>, %arg8: memref<32x32xf32, #tpu.memory_space<vmem>>, %arg9: memref<1x32xf32, #tpu.memory_space<vmem>>, %arg10: memref<1x8x32xf32, #tpu.memory_space<vmem>>, %arg11: memref<1x8x32xf32, #tpu.memory_space<vmem>>, %arg12: memref<1x8x32xf32, #tpu.memory_space<vmem>>, %arg13: memref<1x2x8x8xf32, #tpu.memory_space<vmem>>, %arg14: memref<1x8x32xf32, #tpu.memory_space<vmem>>, %arg15: memref<1x8x32xf32, #tpu.memory_space<vmem>>) attributes {dimension_semantics = [#tpu.dimension_semantics<parallel>], iteration_bounds = array<i64: 2>, scalar_prefetch = 0 : i64, scratch_operands = 0 : i64, tpu.core_type = #tpu.core_type<tc>, window_params = [{transform_indices = @transform_0, window_bounds = array<i64: 1, 8, 32>}, {pipeline_mode = #tpu.pipeline_mode<synchronous>, transform_indices = @transform_1, window_bounds = array<i64: 32, 32>}, {pipeline_mode = #tpu.pipeline_mode<synchronous>, transform_indices = @transform_2, window_bounds = array<i64: 1, 32>}, {pipeline_mode = #tpu.pipeline_mode<synchronous>, transform_indices = @transform_3, window_bounds = array<i64: 32, 32>}, {pipeline_mode = #tpu.pipeline_mode<synchronous>, transform_indices = @transform_4, window_bounds = array<i64: 1, 32>}, {pipeline_mode = #tpu.pipeline_mode<synchronous>, transform_indices = @transform_5, window_bounds = array<i64: 32, 32>}, {pipeline_mode = #tpu.pipeline_mode<synchronous>, transform_indices = @transform_6, window_bounds = array<i64: 1, 32>}, {pipeline_mode = #tpu.pipeline_mode<synchronous>, transform_indices = @transform_7, window_bounds = array<i64: 32, 32>}, {pipeline_mode = #tpu.pipeline_mode<synchronous>, transform_indices = @transform_8, window_bounds = array<i64: 1, 32>}, {transform_indices = @transform_9, window_bounds = array<i64: 1, 8, 32>}, {transform_indices = @transform_10, window_bounds = array<i64: 1, 8, 32>}, {transform_indices = @transform_11, window_bounds = array<i64: 1, 8, 32>}, {transform_indices = @transform_12, window_bounds = array<i64: 1, 2, 8, 8>}, {transform_indices = @transform_13, window_bounds = array<i64: 1, 8, 32>}, {transform_indices = @transform_14, window_bounds = array<i64: 1, 8, 32>}]} {
    %c0 = arith.constant 0 : index
    %c0_0 = arith.constant 0 : index
    %c0_1 = arith.constant 0 : index
    %0 = vector.load %arg1[%c0, %c0_0, %c0_1] : memref<1x8x32xf32, #tpu.memory_space<vmem>>, vector<1x8x32xf32>
    %1 = vector.shape_cast %0 : vector<1x8x32xf32> to vector<8x32xf32>
    %c0_2 = arith.constant 0 : index
    %c0_3 = arith.constant 0 : index
    %2 = vector.load %arg2[%c0_2, %c0_3] : memref<32x32xf32, #tpu.memory_space<vmem>>, vector<32x32xf32>
    %cst = arith.constant dense<0.000000e+00> : vector<8x32xf32>
    %3 = tpu.matmul %1, %2, %cst {dimension_numbers = #tpu.dot_dimension_numbers<[1], [0], [0], [1], [0, 0, 1, 1], [], []>} : vector<8x32xf32>, vector<32x32xf32>, vector<8x32xf32> -> vector<8x32xf32>
    %c0_4 = arith.constant 0 : index
    %c0_5 = arith.constant 0 : index
    %4 = vector.load %arg3[%c0_4, %c0_5] : memref<1x32xf32, #tpu.memory_space<vmem>>, vector<1x32xf32>
    %5 = vector.broadcast %4 : vector<1x32xf32> to vector<8x32xf32>
    %6 = arith.addf %3, %5 : vector<8x32xf32>
    %cst_6 = arith.constant -1.280000e+02 : f32
    %cst_7 = arith.constant 1.270000e+02 : f32
    %7 = vector.broadcast %cst_6 : f32 to vector<8x32xf32>
    %8 = arith.maximumf %7, %6 : vector<8x32xf32>
    %9 = vector.broadcast %cst_7 : f32 to vector<8x32xf32>
    %10 = arith.minimumf %9, %8 : vector<8x32xf32>
    %c0_8 = arith.constant 0 : index
    %c0_9 = arith.constant 0 : index
    %11 = vector.load %arg4[%c0_8, %c0_9] : memref<32x32xf32, #tpu.memory_space<vmem>>, vector<32x32xf32>
    %cst_10 = arith.constant dense<0.000000e+00> : vector<8x32xf32>
    %12 = tpu.matmul %1, %11, %cst_10 {dimension_numbers = #tpu.dot_dimension_numbers<[1], [0], [0], [1], [0, 0, 1, 1], [], []>} : vector<8x32xf32>, vector<32x32xf32>, vector<8x32xf32> -> vector<8x32xf32>
    %c0_11 = arith.constant 0 : index
    %c0_12 = arith.constant 0 : index
    %13 = vector.load %arg5[%c0_11, %c0_12] : memref<1x32xf32, #tpu.memory_space<vmem>>, vector<1x32xf32>
    %14 = vector.broadcast %13 : vector<1x32xf32> to vector<8x32xf32>
    %15 = arith.addf %12, %14 : vector<8x32xf32>
    %cst_13 = arith.constant -1.280000e+02 : f32
    %cst_14 = arith.constant 1.270000e+02 : f32
    %16 = vector.broadcast %cst_13 : f32 to vector<8x32xf32>
    %17 = arith.maximumf %16, %15 : vector<8x32xf32>
    %18 = vector.broadcast %cst_14 : f32 to vector<8x32xf32>
    %19 = arith.minimumf %18, %17 : vector<8x32xf32>
    %c0_15 = arith.constant 0 : index
    %c0_16 = arith.constant 0 : index
    %20 = vector.load %arg6[%c0_15, %c0_16] : memref<32x32xf32, #tpu.memory_space<vmem>>, vector<32x32xf32>
    %cst_17 = arith.constant dense<0.000000e+00> : vector<8x32xf32>
    %21 = tpu.matmul %1, %20, %cst_17 {dimension_numbers = #tpu.dot_dimension_numbers<[1], [0], [0], [1], [0, 0, 1, 1], [], []>} : vector<8x32xf32>, vector<32x32xf32>, vector<8x32xf32> -> vector<8x32xf32>
    %c0_18 = arith.constant 0 : index
    %c0_19 = arith.constant 0 : index
    %22 = vector.load %arg7[%c0_18, %c0_19] : memref<1x32xf32, #tpu.memory_space<vmem>>, vector<1x32xf32>
    %23 = vector.broadcast %22 : vector<1x32xf32> to vector<8x32xf32>
    %24 = arith.addf %21, %23 : vector<8x32xf32>
    %cst_20 = arith.constant -1.280000e+02 : f32
    %cst_21 = arith.constant 1.270000e+02 : f32
    %25 = vector.broadcast %cst_20 : f32 to vector<8x32xf32>
    %26 = arith.maximumf %25, %24 : vector<8x32xf32>
    %27 = vector.broadcast %cst_21 : f32 to vector<8x32xf32>
    %28 = arith.minimumf %27, %26 : vector<8x32xf32>
    %c0_22 = arith.constant 0 : index
    %c0_23 = arith.constant 0 : index
    %c0_24 = arith.constant 0 : index
    %29 = vector.load %arg10[%c0_22, %c0_23, %c0_24] : memref<1x8x32xf32, #tpu.memory_space<vmem>>, vector<1x8x32xf32>
    %30 = vector.shape_cast %29 : vector<1x8x32xf32> to vector<8x32xf32>
    %31 = vector.shape_cast %10 : vector<8x32xf32> to vector<1x8x32xf32>
    tpu.vector_store %arg10[%c0_22, %c0_23, %c0_24], %31 {strides = array<i32>} : memref<1x8x32xf32, #tpu.memory_space<vmem>>, vector<1x8x32xf32>,
    %c0_25 = arith.constant 0 : index
    %c0_26 = arith.constant 0 : index
    %c0_27 = arith.constant 0 : index
    %32 = vector.load %arg11[%c0_25, %c0_26, %c0_27] : memref<1x8x32xf32, #tpu.memory_space<vmem>>, vector<1x8x32xf32>
    %33 = vector.shape_cast %32 : vector<1x8x32xf32> to vector<8x32xf32>
    %34 = vector.shape_cast %19 : vector<8x32xf32> to vector<1x8x32xf32>
    tpu.vector_store %arg11[%c0_25, %c0_26, %c0_27], %34 {strides = array<i32>} : memref<1x8x32xf32, #tpu.memory_space<vmem>>, vector<1x8x32xf32>,
    %c0_28 = arith.constant 0 : index
    %c0_29 = arith.constant 0 : index
    %c0_30 = arith.constant 0 : index
    %35 = vector.load %arg12[%c0_28, %c0_29, %c0_30] : memref<1x8x32xf32, #tpu.memory_space<vmem>>, vector<1x8x32xf32>
    %36 = vector.shape_cast %35 : vector<1x8x32xf32> to vector<8x32xf32>
    %37 = vector.shape_cast %28 : vector<8x32xf32> to vector<1x8x32xf32>
    tpu.vector_store %arg12[%c0_28, %c0_29, %c0_30], %37 {strides = array<i32>} : memref<1x8x32xf32, #tpu.memory_space<vmem>>, vector<1x8x32xf32>,
    %38 = vector.extract_strided_slice %10 {offsets = [0, 0], sizes = [8, 16], strides = [1, 1]} : vector<8x32xf32> to vector<8x16xf32>
    %39 = vector.extract_strided_slice %19 {offsets = [0, 0], sizes = [8, 16], strides = [1, 1]} : vector<8x32xf32> to vector<8x16xf32>
    %40 = vector.extract_strided_slice %28 {offsets = [0, 0], sizes = [8, 16], strides = [1, 1]} : vector<8x32xf32> to vector<8x16xf32>
    %cst_31 = arith.constant dense<0.000000e+00> : vector<8x8xf32>
    %41 = tpu.matmul %38, %39, %cst_31 {dimension_numbers = #tpu.dot_dimension_numbers<[1], [1], [0], [0], [0, 0, 1, 0], [], []>} : vector<8x16xf32>, vector<8x16xf32>, vector<8x8xf32> -> vector<8x8xf32>
    %cst_32 = arith.constant -1.280000e+02 : f32
    %cst_33 = arith.constant 1.270000e+02 : f32
    %42 = vector.broadcast %cst_32 : f32 to vector<8x8xf32>
    %43 = arith.maximumf %42, %41 : vector<8x8xf32>
    %44 = vector.broadcast %cst_33 : f32 to vector<8x8xf32>
    %45 = arith.minimumf %44, %43 : vector<8x8xf32>
    %c0_34 = arith.constant 0 : index
    %c0_35 = arith.constant 0 : index
    %c0_36 = arith.constant 0 : index
    %c0_37 = arith.constant 0 : index
    %46 = vector.load %arg13[%c0_34, %c0_35, %c0_36, %c0_37] : memref<1x2x8x8xf32, #tpu.memory_space<vmem>>, vector<1x1x8x8xf32>
    %47 = vector.shape_cast %46 : vector<1x1x8x8xf32> to vector<8x8xf32>
    %48 = vector.shape_cast %45 : vector<8x8xf32> to vector<1x1x8x8xf32>
    tpu.vector_store %arg13[%c0_34, %c0_35, %c0_36, %c0_37], %48 {strides = array<i32>} : memref<1x2x8x8xf32, #tpu.memory_space<vmem>>, vector<1x1x8x8xf32>,
    %cst_38 = arith.constant dense<0.000000e+00> : vector<8x16xf32>
    %49 = tpu.matmul %45, %40, %cst_38 {dimension_numbers = #tpu.dot_dimension_numbers<[1], [0], [0], [1], [0, 0, 1, 1], [], []>} : vector<8x8xf32>, vector<8x16xf32>, vector<8x16xf32> -> vector<8x16xf32>
    %cst_39 = arith.constant -1.280000e+02 : f32
    %cst_40 = arith.constant 1.270000e+02 : f32
    %50 = vector.broadcast %cst_39 : f32 to vector<8x16xf32>
    %51 = arith.maximumf %50, %49 : vector<8x16xf32>
    %52 = vector.broadcast %cst_40 : f32 to vector<8x16xf32>
    %53 = arith.minimumf %52, %51 : vector<8x16xf32>
    %54 = vector.extract_strided_slice %10 {offsets = [0, 16], sizes = [8, 16], strides = [1, 1]} : vector<8x32xf32> to vector<8x16xf32>
    %55 = vector.extract_strided_slice %19 {offsets = [0, 16], sizes = [8, 16], strides = [1, 1]} : vector<8x32xf32> to vector<8x16xf32>
    %56 = vector.extract_strided_slice %28 {offsets = [0, 16], sizes = [8, 16], strides = [1, 1]} : vector<8x32xf32> to vector<8x16xf32>
    %cst_41 = arith.constant dense<0.000000e+00> : vector<8x8xf32>
    %57 = tpu.matmul %54, %55, %cst_41 {dimension_numbers = #tpu.dot_dimension_numbers<[1], [1], [0], [0], [0, 0, 1, 0], [], []>} : vector<8x16xf32>, vector<8x16xf32>, vector<8x8xf32> -> vector<8x8xf32>
    %cst_42 = arith.constant -1.280000e+02 : f32
    %cst_43 = arith.constant 1.270000e+02 : f32
    %58 = vector.broadcast %cst_42 : f32 to vector<8x8xf32>
    %59 = arith.maximumf %58, %57 : vector<8x8xf32>
    %60 = vector.broadcast %cst_43 : f32 to vector<8x8xf32>
    %61 = arith.minimumf %60, %59 : vector<8x8xf32>
    %c0_44 = arith.constant 0 : index
    %c1 = arith.constant 1 : index
    %c0_45 = arith.constant 0 : index
    %c0_46 = arith.constant 0 : index
    %62 = vector.load %arg13[%c0_44, %c1, %c0_45, %c0_46] : memref<1x2x8x8xf32, #tpu.memory_space<vmem>>, vector<1x1x8x8xf32>
    %63 = vector.shape_cast %62 : vector<1x1x8x8xf32> to vector<8x8xf32>
    %64 = vector.shape_cast %61 : vector<8x8xf32> to vector<1x1x8x8xf32>
    tpu.vector_store %arg13[%c0_44, %c1, %c0_45, %c0_46], %64 {strides = array<i32>} : memref<1x2x8x8xf32, #tpu.memory_space<vmem>>, vector<1x1x8x8xf32>,
    %cst_47 = arith.constant dense<0.000000e+00> : vector<8x16xf32>
    %65 = tpu.matmul %61, %56, %cst_47 {dimension_numbers = #tpu.dot_dimension_numbers<[1], [0], [0], [1], [0, 0, 1, 1], [], []>} : vector<8x8xf32>, vector<8x16xf32>, vector<8x16xf32> -> vector<8x16xf32>
    %cst_48 = arith.constant -1.280000e+02 : f32
    %cst_49 = arith.constant 1.270000e+02 : f32
    %66 = vector.broadcast %cst_48 : f32 to vector<8x16xf32>
    %67 = arith.maximumf %66, %65 : vector<8x16xf32>
    %68 = vector.broadcast %cst_49 : f32 to vector<8x16xf32>
    %69 = arith.minimumf %68, %67 : vector<8x16xf32>
    %70 = tpu.concatenate %53, %69 in 1 : vector<8x16xf32>, vector<8x16xf32> -> vector<8x32xf32>
    %c0_50 = arith.constant 0 : index
    %c0_51 = arith.constant 0 : index
    %c0_52 = arith.constant 0 : index
    %71 = vector.load %arg14[%c0_50, %c0_51, %c0_52] : memref<1x8x32xf32, #tpu.memory_space<vmem>>, vector<1x8x32xf32>
    %72 = vector.shape_cast %71 : vector<1x8x32xf32> to vector<8x32xf32>
    %73 = vector.shape_cast %70 : vector<8x32xf32> to vector<1x8x32xf32>
    tpu.vector_store %arg14[%c0_50, %c0_51, %c0_52], %73 {strides = array<i32>} : memref<1x8x32xf32, #tpu.memory_space<vmem>>, vector<1x8x32xf32>,
    %c0_53 = arith.constant 0 : index
    %c0_54 = arith.constant 0 : index
    %74 = vector.load %arg8[%c0_53, %c0_54] : memref<32x32xf32, #tpu.memory_space<vmem>>, vector<32x32xf32>
    %cst_55 = arith.constant dense<0.000000e+00> : vector<8x32xf32>
    %75 = tpu.matmul %70, %74, %cst_55 {dimension_numbers = #tpu.dot_dimension_numbers<[1], [0], [0], [1], [0, 0, 1, 1], [], []>} : vector<8x32xf32>, vector<32x32xf32>, vector<8x32xf32> -> vector<8x32xf32>
    %c0_56 = arith.constant 0 : index
    %c0_57 = arith.constant 0 : index
    %76 = vector.load %arg9[%c0_56, %c0_57] : memref<1x32xf32, #tpu.memory_space<vmem>>, vector<1x32xf32>
    %77 = vector.broadcast %76 : vector<1x32xf32> to vector<8x32xf32>
    %78 = arith.addf %75, %77 : vector<8x32xf32>
    %cst_58 = arith.constant -1.280000e+02 : f32
    %cst_59 = arith.constant 1.270000e+02 : f32
    %79 = vector.broadcast %cst_58 : f32 to vector<8x32xf32>
    %80 = arith.maximumf %79, %78 : vector<8x32xf32>
    %81 = vector.broadcast %cst_59 : f32 to vector<8x32xf32>
    %82 = arith.minimumf %81, %80 : vector<8x32xf32>
    %c0_60 = arith.constant 0 : index
    %c0_61 = arith.constant 0 : index
    %c0_62 = arith.constant 0 : index
    %83 = vector.load %arg15[%c0_60, %c0_61, %c0_62] : memref<1x8x32xf32, #tpu.memory_space<vmem>>, vector<1x8x32xf32>
    %84 = vector.shape_cast %83 : vector<1x8x32xf32> to vector<8x32xf32>
    %85 = vector.shape_cast %82 : vector<8x32xf32> to vector<1x8x32xf32>
    tpu.vector_store %arg15[%c0_60, %c0_61, %c0_62], %85 {strides = array<i32>} : memref<1x8x32xf32, #tpu.memory_space<vmem>>, vector<1x8x32xf32>,
    return
  }
  func.func @transform_0(%arg0: i32) -> (i32, i32, i32) {
    %c0_i32 = arith.constant 0 : i32
    %c0_i32_0 = arith.constant 0 : i32
    %c0_i32_1 = arith.constant 0 : i32
    return %arg0, %c0_i32, %c0_i32_0 : i32, i32, i32
  }
  func.func @transform_1(%arg0: i32) -> (i32, i32) {
    %c0_i32 = arith.constant 0 : i32
    %c0_i32_0 = arith.constant 0 : i32
    %c0_i32_1 = arith.constant 0 : i32
    return %c0_i32, %c0_i32_0 : i32, i32
  }
  func.func @transform_2(%arg0: i32) -> (i32, i32) {
    %c0_i32 = arith.constant 0 : i32
    %c0_i32_0 = arith.constant 0 : i32
    %c0_i32_1 = arith.constant 0 : i32
    return %c0_i32, %c0_i32_0 : i32, i32
  }
  func.func @transform_3(%arg0: i32) -> (i32, i32) {
    %c0_i32 = arith.constant 0 : i32
    %c0_i32_0 = arith.constant 0 : i32
    %c0_i32_1 = arith.constant 0 : i32
    return %c0_i32, %c0_i32_0 : i32, i32
  }
  func.func @transform_4(%arg0: i32) -> (i32, i32) {
    %c0_i32 = arith.constant 0 : i32
    %c0_i32_0 = arith.constant 0 : i32
    %c0_i32_1 = arith.constant 0 : i32
    return %c0_i32, %c0_i32_0 : i32, i32
  }
  func.func @transform_5(%arg0: i32) -> (i32, i32) {
    %c0_i32 = arith.constant 0 : i32
    %c0_i32_0 = arith.constant 0 : i32
    %c0_i32_1 = arith.constant 0 : i32
    return %c0_i32, %c0_i32_0 : i32, i32
  }
  func.func @transform_6(%arg0: i32) -> (i32, i32) {
    %c0_i32 = arith.constant 0 : i32
    %c0_i32_0 = arith.constant 0 : i32
    %c0_i32_1 = arith.constant 0 : i32
    return %c0_i32, %c0_i32_0 : i32, i32
  }
  func.func @transform_7(%arg0: i32) -> (i32, i32) {
    %c0_i32 = arith.constant 0 : i32
    %c0_i32_0 = arith.constant 0 : i32
    %c0_i32_1 = arith.constant 0 : i32
    return %c0_i32, %c0_i32_0 : i32, i32
  }
  func.func @transform_8(%arg0: i32) -> (i32, i32) {
    %c0_i32 = arith.constant 0 : i32
    %c0_i32_0 = arith.constant 0 : i32
    %c0_i32_1 = arith.constant 0 : i32
    return %c0_i32, %c0_i32_0 : i32, i32
  }
  func.func @transform_9(%arg0: i32) -> (i32, i32, i32) {
    %c0_i32 = arith.constant 0 : i32
    %c0_i32_0 = arith.constant 0 : i32
    %c0_i32_1 = arith.constant 0 : i32
    return %arg0, %c0_i32, %c0_i32_0 : i32, i32, i32
  }
  func.func @transform_10(%arg0: i32) -> (i32, i32, i32) {
    %c0_i32 = arith.constant 0 : i32
    %c0_i32_0 = arith.constant 0 : i32
    %c0_i32_1 = arith.constant 0 : i32
    return %arg0, %c0_i32, %c0_i32_0 : i32, i32, i32
  }
  func.func @transform_11(%arg0: i32) -> (i32, i32, i32) {
    %c0_i32 = arith.constant 0 : i32
    %c0_i32_0 = arith.constant 0 : i32
    %c0_i32_1 = arith.constant 0 : i32
    return %arg0, %c0_i32, %c0_i32_0 : i32, i32, i32
  }
  func.func @transform_12(%arg0: i32) -> (i32, i32, i32, i32) {
    %c0_i32 = arith.constant 0 : i32
    %c0_i32_0 = arith.constant 0 : i32
    %c0_i32_1 = arith.constant 0 : i32
    %c0_i32_2 = arith.constant 0 : i32
    return %arg0, %c0_i32, %c0_i32_0, %c0_i32_1 : i32, i32, i32, i32
  }
  func.func @transform_13(%arg0: i32) -> (i32, i32, i32) {
    %c0_i32 = arith.constant 0 : i32
    %c0_i32_0 = arith.constant 0 : i32
    %c0_i32_1 = arith.constant 0 : i32
    return %arg0, %c0_i32, %c0_i32_0 : i32, i32, i32
  }
  func.func @transform_14(%arg0: i32) -> (i32, i32, i32) {
    %c0_i32 = arith.constant 0 : i32
    %c0_i32_0 = arith.constant 0 : i32
    %c0_i32_1 = arith.constant 0 : i32
    return %arg0, %c0_i32, %c0_i32_0 : i32, i32, i32
  }
}

</mosaic_0001>

<bundles_post_ra>
// kernel: tpu_custom_call.1
= control target key start
LH: loop header
LB: loop body
LE: loop exit
PB: predicated region body
PF: predicated region fallthrough
CT: control target
= control target key end

     0   :  { %s2778_s0 = inlined_call_operand.hbm [shape: f32[2,8,32], index: 0, kind: input, shape index: {}]   ;;  %s2779_s1 = inlined_call_operand.hbm [shape: f32[32,32], index: 1, kind: input, shape index: {}]   ;;  %s2780_s2 = inlined_call_operand.vmem [shape: f32[1,32], index: 2, kind: input, shape index: {}]   ;;  %s2781_s3 = inlined_call_operand.hbm [shape: f32[32,32], index: 3, kind: input, shape index: {}]   ;;  %s2782_s4 = inlined_call_operand.vmem [shape: f32[1,32], index: 4, kind: input, shape index: {}]   ;;  %s2783_s5 = inlined_call_operand.hbm [shape: f32[32,32], index: 5, kind: input, shape index: {}]   ;;  %s2784_s6 = inlined_call_operand.vmem [shape: f32[1,32], index: 6, kind: input, shape index: {}]   ;;  %s2785_s7 = inlined_call_operand.hbm [shape: f32[32,32], index: 7, kind: input, shape index: {}]   ;;  %s2786_s8 = inlined_call_operand.vmem [shape: f32[1,32], index: 8, kind: input, shape index: {}]   ;;  %s2787_s9 = inlined_call_operand.hbm [shape: f32[2,8,32], index: 9, kind: output, shape index: {0}]   ;;  %s2788_s10 = inlined_call_operand.hbm [shape: f32[2,8,32], index: 10, kind: output, shape index: {1}]   ;;  %s2789_s11 = inlined_call_operand.hbm [shape: f32[2,8,32], index: 11, kind: output, shape index: {2}]   ;;  %s2790_s12 = inlined_call_operand.hbm [shape: f32[2,2,8,8], index: 12, kind: output, shape index: {3}]   ;;  %s2791_s13 = inlined_call_operand.hbm [shape: f32[2,8,32], index: 13, kind: output, shape index: {4}]   ;;  %s2792_s14 = inlined_call_operand.hbm [shape: f32[2,8,32], index: 14, kind: output, shape index: {5}]  }
   0x1   :  { %2808 = sst [smem:[#allocation32_spill]] %s2778_s0 }
   0x2   :  { %2809 = sst [smem:[#allocation33_spill]] %s2779_s1 }
   0x3   :  { %2810 = sst [smem:[#allocation34_spill]] %s2780_s2 }
   0x4   :  { %2811 = sst [smem:[#allocation35_spill]] %s2781_s3 }
   0x5   :  { %2812 = sst [smem:[#allocation36_spill]] %s2782_s4 }
   0x6   :  { %2813 = sst [smem:[#allocation37_spill]] %s2783_s5 }
   0x7   :  { %2814 = sst [smem:[#allocation38_spill]] %s2785_s7 }
   0x8   :  { %20 = vsyncpa [#allocation3], 0 }
   0x9   :  { %22 = vsyncpa [#allocation3 + $0x1], 0 }
   0xa   :  { %23 = vsyncpa [#allocation6], 0 }
   0xb   :  { %24 = vsyncpa [#allocation9], 0 }
   0xc   :  { %25 = vsyncpa [#allocation4], 0 }
   0xd   :  { %27 = vsyncpa [#allocation4 + $0x1], 0 }
   0xe   :  { %28 = vsyncpa [#allocation13], 0 }
   0xf   :  { %30 = vsyncpa [#allocation13 + $0x1], 0 }
  0x10   :  { %31 = vsyncpa [#allocation16], 0 }
  0x11   :  { %33 = vsyncpa [#allocation16 + $0x1], 0 }
  0x12   :  { %34 = vsyncpa [#allocation19], 0 }
  0x13   :  { %36 = vsyncpa [#allocation19 + $0x1], 0  ;;  %s2328_s29 = smov 0   ;;  %s2330_s30 = smov 0  }
  0x14   :  { %s2332_s15 = smov 0   ;;  %s2334_s16 = smov 0  }
  0x15 LB: > { %2815 = sst [smem:[#allocation27_spill]] %s2228_s15  ;;  %s2234_s17 = smov [#allocation5]   ;;  %s2232_s16 = sphi %s2334_s16, %s2850_s16   ;;  %s2228_s15 = sphi %s2332_s15, %s2852_s15   ;;  %s2224_s30 = sphi %s2330_s30, %s2854_s30   ;;  %s2220_s29 = sphi %s2328_s29, %s2853_s29  }
  0x16   : > { %2816 = sst [smem:[#allocation28_spill]] %s2232_s16  ;;  %s409_s18 = sshll.u32 %s2234_s17, 4  ;;  %s410_s18 = int_to_ptr.vmem [resolvable:$true] %s409_s18 }
  0x17   : > { %s2349_s19 = sadd.s32 4294967295, %s2232_s16   ;;  %p1623_p0 = scmp.ge.s32.totalorder %s2232_s16, 1 }
  0x18   : > { %p2797_p1 = scmp.eq.s32.totalorder %s2349_s19, 0  ;;  %p397_p2 = scmp.lt.s32.totalorder %s2232_s16, 3 }
  0x19   : > { %s2235_s21 = smov [#allocation8]   ;;  %s2236_s24 = smov [#allocation7]  }
  0x1a   : > { %p2354_p3 = pnand %p1623_p0, %p397_p2  ;;  %s441_s22 = sshll.u32 %s2235_s21, 4  ;;  %s2367_s22 = int_to_ptr.vmem [resolvable:$true] %s441_s22 }
  0x1b   : > { %s425_s25 = sshll.u32 %s2236_s24, 4  ;;  %s1897_s26 = scalar_lea.vmem %s410_s18, 512  ;;  %s2369_s25 = int_to_ptr.vmem [resolvable:$true] %s425_s25 }
  0x1c   : > { %s2817_s20 = scalar_select %p2354_p3, 1, 0 }
  0x1d   : > { %p1796_p5 = pneg %p2354_p3  ;;  %p1898_p8 = scmp.ne.s32.totalorder %s410_s18, %s1897_s26 }
  0x1e   : > { %p1905_p11 = scmp.lt.s32.totalorder %s410_s18, %s410_s18  ;;  %p1906_p12 = scmp.lt.s32.totalorder %s1897_s26, %s1897_s26 }
  0x1f   : > { %p2363_p6 = pnand %p1796_p5, %p2797_p1 }
  0x20   : > { %p1907_p13 = por %p1906_p12, %p1905_p11 }
  0x21   : > { %p1888_p7 = pneg %p2363_p6 }
  0x23   : > { %p1900_p9 = pnand %p1898_p8, %p1888_p7 }
  0x25   : > { %p1901_p10 = pneg %p1900_p9 }
  0x27   : > { %p1908_p0 = pnand %p1907_p13, %p1901_p10 }
  0x29   : > { %1911 = shalt.err (!%p1908_p0)
}
  0x2a   : > { %s2237_s27 = smov 128   ;;  %s2238_s28 = smov 8  }
  0x2b   : > { %s2819_s1 = sld [smem:[#allocation33_spill]]  ;;  %s1923_s24 = scalar_lea.vmem %s2367_s22, 512 }
  0x2c   : > { %p1924_p2 = scmp.ne.s32.totalorder %s2367_s22, %s1923_s24  ;;  %p1931_p9 = scmp.lt.s32.totalorder %s2367_s22, %s2367_s22 }
  0x2d   : > { %p1932_p10 = scmp.lt.s32.totalorder %s1923_s24, %s1923_s24 }
  0x2e   : > { %p1926_p5 = pnand %p1924_p2, %p1888_p7 }
  0x2f   : > { %p1933_p11 = por %p1932_p10, %p1931_p9 }
  0x30   : > { %p1927_p8 = pneg %p1926_p5 }
  0x31   : > { %1799 = dma.hbm_to_vmem [thread:$0]  (!%p2363_p6), %s2819_s1, 512, %s410_s18, [#allocation6], %s2237_s27, %s2237_s27, %s2238_s28  }
  0x32   : > { %p1934_p12 = pnand %p1933_p11, %p1927_p8 }
  0x34   : > { %1937 = shalt.err (!%p1934_p12)
}
  0x35   : > { %s2820_s5 = sld [smem:[#allocation37_spill]]  ;;  %s1949_s17 = scalar_lea.vmem %s2369_s25, 512 }
  0x36   : > { %p1950_p13 = scmp.ne.s32.totalorder %s2369_s25, %s1949_s17  ;;  %p1957_p5 = scmp.lt.s32.totalorder %s2369_s25, %s2369_s25 }
  0x37   : > { %p1958_p8 = scmp.lt.s32.totalorder %s1949_s17, %s1949_s17 }
  0x38   : > { %p1952_p0 = pnand %p1950_p13, %p1888_p7 }
  0x39   : > { %p1959_p9 = por %p1958_p8, %p1957_p5 }
  0x3a   : > { %p1953_p2 = pneg %p1952_p0 }
  0x3b   : > { %1805 = dma.hbm_to_vmem [thread:$0]  (!%p2363_p6), %s2820_s5, 512, %s2367_s22, [#allocation9], %s2237_s27, %s2237_s27, %s2238_s28  }
  0x3c   : > { %p1960_p10 = pnand %p1959_p9, %p1953_p2 }
  0x3e   : > { %1963 = shalt.err (!%p1960_p10)
}
  0x3f   : > { %s2821_s3 = sld [smem:[#allocation35_spill]]  ;;  %s2239_s24 = smov [#allocation10]  }
  0x40   : > { %s457_s26 = sshll.u32 %s2239_s24, 4  ;;  %s458_s26 = int_to_ptr.vmem [resolvable:$true] %s457_s26 }
  0x41   : > { %s1975_s18 = scalar_lea.vmem %s458_s26, 512  ;;  %p1983_p0 = scmp.lt.s32.totalorder %s458_s26, %s458_s26 }
  0x42   : > { %p1976_p11 = scmp.ne.s32.totalorder %s458_s26, %s1975_s18  ;;  %p1984_p2 = scmp.lt.s32.totalorder %s1975_s18, %s1975_s18 }
  0x44   : > { %p1978_p12 = pnand %p1976_p11, %p1888_p7  ;;  %p1985_p5 = por %p1984_p2, %p1983_p0 }
  0x45   : > { %1802 = dma.hbm_to_vmem [thread:$0]  (!%p2363_p6), %s2821_s3, 512, %s2369_s25, [#allocation6], %s2237_s27, %s2237_s27, %s2238_s28  }
  0x46   : > { %p1979_p13 = pneg %p1978_p12 }
  0x48   : > { %p1986_p8 = pnand %p1985_p5, %p1979_p13 }
  0x4a   : > { %1989 = shalt.err (!%p1986_p8)
}
  0x4b   : > { %s2822_s7 = sld [smem:[#allocation38_spill]]  ;;  %s2793_s23 = sadd.s32 4294967294, %s2232_s16  }
  0x4c   : > { %s2429_s21 = sadd.s32 1, %s2232_s16   ;;  %s49_s24 = sadd.s32 1, %s2228_s15 }
  0x4d   : > { %2823 = sst [smem:[#allocation29_spill]] %s2429_s21  ;;  %s46_s22 = ssub.s32 %s2232_s16, %s2429_s21 }
  0x4e   : > { %p47_p7 = scmp.eq.s32.totalorder %s46_s22, 0  ;;  %p56_p9 = scmp.ne.s32.totalorder %s2228_s15, %s2224_s30 }
  0x4f   : > { %p57_p10 = scmp.eq.s32.totalorder %s2232_s16, 0  ;;  %p62_p11 = scmp.ne.s32.totalorder %s2224_s30, %s2220_s29 }
  0x50   : > { %s2440_s18 = scalar_select %p47_p7, %s2228_s15, %s49_s24  }
  0x51   : > { %1808 = dma.hbm_to_vmem [thread:$0]  (!%p2363_p6), %s2822_s7, 512, %s458_s26, [#allocation9], %s2237_s27, %s2237_s27, %s2238_s28  }
  0x52   : > { %2824 = sst [smem:[#allocation30_spill]] %s2440_s18  ;;  %p2442_p12 = por %p57_p10, %p56_p9 }
  0x53   : > { %p2448_p6 = por %p2797_p1, %p62_p11  ;;  %p254_p13 = scmp.eq.s32.totalorder %s2349_s19, 1 }
  0x54   : > { %p260_p0 = scmp.eq.s32.totalorder %s2793_s23, 1  ;;  %p1836_p2 = scmp.lt.s32.totalorder %s2232_s16, 2 }
  0x55   : > { %s2826_s27 = scalar_select %p2448_p6, 1, 0 }
  0x56   : > { %s474_s28 = sand.u32 1, %s2228_s15   ;;  %p2457_p5 = por %p254_p13, %p56_p9 }
  0x57   : > { %p2461_p8 = por %p260_p0, %p62_p11  ;;  %s1629_s22 = sshll.u32 %s474_s28, 3 }
  0x58   : > { %s2827_s26 = scalar_select %p2457_p5, 1, 0 }
  0x59   : > { %s2828_s17 = scalar_select %p2461_p8, 1, 0 }
  0x5a   : > { %s1630_s24 = sshll.u32 %s2232_s16, 7  ;;  %s2830_s0 = sld [smem:[#allocation32_spill]] }
  0x5b   : > { %2829 = sst [smem:[#allocation31_spill]] %s2828_s17  ;;  %s478_s23 = scalar_lea.vmem [#allocation2], %s1629_s22 }
  0x5c   : > { %s485_s7 = sshll.u32 %s478_s23, 4  ;;  %p2473_p7 = pnand %p1836_p2, %p2442_p12  ;;  %s486_s7 = int_to_ptr.vmem [resolvable:$true] %s485_s7 }
  0x5d   : > { %s475_s15 = scalar_lea.sflag [#allocation3], %s474_s28 }
  0x5e   : > { %p1992_p10 = pneg %p2473_p7 }
  0x60   : > { %s2469_s5 = scalar_lea.hbm %s2830_s0, %s1630_s24  ;;  %s1995_s24 = scalar_lea.hbm %s2830_s0, 256 }
  0x61   : > { %s1990_s21 = scalar_lea.hbm %s2469_s5, 128  ;;  %p1996_p0 = scmp.lt.s32.totalorder %s2469_s5, %s2830_s0 }
  0x62   : > { %p1991_p9 = scmp.ne.s32.totalorder %s2469_s5, %s1990_s21  ;;  %p1997_p12 = scmp.lt.s32.totalorder %s1995_s24, %s1990_s21 }
  0x64   : > { %p1993_p11 = pnand %p1992_p10, %p1991_p9  ;;  %p1998_p2 = por %p1997_p12, %p1996_p0 }
  0x66   : > { %p1994_p13 = pneg %p1993_p11 }
  0x68   : > { %p1999_p4 = pnand %p1998_p2, %p1994_p13 }
  0x6a   : > { %2002 = shalt.err (!%p1999_p4)
}
  0x6b   : > { %s2003_s25 = scalar_lea.vmem %s486_s7, 128  ;;  %s2240_s28 = smov [#allocation2]  }
  0x6c   : > { %p2004_p1 = scmp.ne.s32.totalorder %s486_s7, %s2003_s25  ;;  %s2008_s16 = sshll.u32 %s2240_s28, 4  ;;  %s2009_s16 = int_to_ptr.vmem [resolvable:$false] %s2008_s16 }
  0x6d   : > { %s2010_s17 = scalar_lea.vmem %s2009_s16, 256  ;;  %p2011_p9 = scmp.lt.s32.totalorder %s486_s7, %s2009_s16 }
  0x6e   : > { %p2006_p8 = pnand %p2004_p1, %p1992_p10  ;;  %p2012_p11 = scmp.lt.s32.totalorder %s2010_s17, %s2003_s25 }
  0x70   : > { %p2007_p5 = pneg %p2006_p8  ;;  %p2013_p6 = por %p2012_p11, %p2011_p9 }
  0x72   : > { %p2014_p3 = pnand %p2013_p6, %p2007_p5 }
  0x74   : > { %2017 = shalt.err (!%p2014_p3)
}
  0x75   : > { %1812 = dma.hbm_to_vmem [thread:$0]  (!%p2473_p7), %s2469_s5, 128, %s486_s7, %s475_s15  }
  0x76   : > { %p2832_p13 = scmp.ne.s32.totalorder %s2817_s20, 0 }
  0x77   : > { %s2494_s21 = sand.u32 (!%p2832_p13), 1, %s2224_s30   ;;  %p2833_p1 = scmp.ne.s32.totalorder (!%p2832_p13), %s2826_s27, 0 }
  0x78   : > { %494 = sbr.rel (%p2832_p13) target bundleno = 1267 (0x4f3), region = 56  ;;  %s2497_s1 = sshll.u32 (!%p2832_p13), %s2494_s21, 3 }
  0x79   : > { %s497_s16 = scalar_lea.sflag (!%p2832_p13), [#allocation3], %s2494_s21  ;;  %s500_s17 = scalar_lea.vmem (!%p2832_p13), [#allocation2], %s2497_s1 }
  0x7d   : > { %2191 = dma.done.wait (%p2833_p1), %s497_s16, 128  }
  0x7e   : > { %2193 = vsyncadd (%p2833_p1), %s497_s16, 4294967168  ;;  %p2834_p3 = scmp.eq.s32.totalorder %s2349_s19, 0 }
  0x80   : > { %2195 = dma.done.wait (%p2834_p3), [#allocation6], 1024   ;;  %p2835_p4 = pmov %p2834_p3 }
  0x81   : > { %p2836_p6 = pmov %p2834_p3 }
  0x82   : > { %2197 = vsyncadd (%p2835_p4), [#allocation6], 4294966272 }
  0x83   : > { %2199 = dma.done.wait (%p2836_p6), [#allocation9], 1024   ;;  %p2837_p5 = pmov %p2834_p3 }
  0x84   : > { %v2241_v0 = vmov 0.0   ;;  %vm2242_vm0 = vmmov 0   ;;  %v677_v1 = vld [vmem:[#allocation7 + $0x18] sm:$0xff]  ;;  %v676_v3 = vld [vmem:[#allocation7 + $0x10] sm:$0xff]  ;;  %v675_v5 = vld [vmem:[#allocation7 + $0x8] sm:$0xff]  ;;  %vm598_vm1 = vcmask 261120  }
  0x85   : > { %2201 = vsyncadd (%p2837_p5), [#allocation9], 4294966272  ;;  %1713 = vmatprep.subr.mxu1 %v2241_v0  ;;  %1702 = vmatprep.subr.mxu0 %v2241_v0  ;;  %v590_v2 = vld [vmem:[#allocation5 + $0x18] sm:$0xff]  ;;  %v589_v4 = vld [vmem:[#allocation5 + $0x10] sm:$0xff]  ;;  %s2838_s4 = sld [smem:[#allocation36_spill]]  ;;  %vm843_vm2 = vcmask 130048  }
  0x86   : > { %1721 = vmatprep.mubr.msk.f32.mxu1 %vm2242_vm0, %v2241_v0  ;;  %1710 = vmatprep.mubr.msk.f32.mxu0 %vm2242_vm0, %v2241_v0  ;;  %v588_v6 = vld [vmem:[#allocation5 + $0x8] sm:$0xff]  ;;  %v674_v7 = vld [vmem:[#allocation7] sm:$0xff]  ;;  %v586_v9 = vld [vmem:[%s500_s17] sm:$0xff]  ;;  %s2839_s2 = sld [smem:[#allocation34_spill]]  ;;  %s2243_s18 = smov 112   ;;  %vm922_vm3 = vcmask 64512  }
  0x87   : > { %1714 = vmatpush3.msra.mxu1 %v677_v1  ;;  %1703 = vmatpush3.msra.mxu0 %v590_v2  ;;  %v587_v8 = vld [vmem:[#allocation5] sm:$0xff]  ;;  %v760_v10 = vld [vmem:[#allocation8 + $0x18] sm:$0xff]  ;;  %v759_v11 = vld [vmem:[#allocation8 + $0x10] sm:$0xff]  ;;  %s557_s27 = scalar_lea.vmem [#allocation12], %s2497_s1  ;;  %s2806_s3 = scalar_lea.vmem [#allocation11], %s2497_s1 }
  0x88   : > { %1715 = vmatprep.subr.mxu1 %v2241_v0  ;;  %1704 = vmatprep.subr.mxu0 %v2241_v0  ;;  %v758_v12 = vld [vmem:[#allocation8 + $0x8] sm:$0xff]  ;;  %v757_v13 = vld [vmem:[#allocation8] sm:$0xff]  ;;  %v1647_v26 = vld [vmem:[%s2784_s6] ss:$0 sm:$0xff]  ;;  %s2805_s23 = scalar_lea.vmem [#allocation14], %s2497_s1  ;;  %s1640_s25 = sshll.u32 %s2494_s21, 4 }
  0x89   : > { %1716 = vmatpush3.msra.mxu1 %v676_v3  ;;  %1705 = vmatpush3.msra.mxu0 %v589_v4  ;;  %s2570_s28 = scalar_lea.vmem [#allocation15], %s1640_s25  ;;  %v1169_v45 = vld [vmem:[#allocation10 + $0x18] sm:$0xff]  ;;  %v1168_v46 = vld [vmem:[#allocation10 + $0x10] sm:$0xff]  ;;  %v1167_v47 = vld [vmem:[#allocation10 + $0x8] sm:$0xff]  ;;  %s2244_s16 = smov 16  }
  0x8a   : > { %1717 = vmatprep.subr.mxu1 %v2241_v0  ;;  %1706 = vmatprep.subr.mxu0 %v2241_v0  ;;  %v1166_v48 = vld [vmem:[#allocation10] sm:$0xff]  ;;  %s2804_s17 = scalar_lea.vmem [#allocation17], %s2497_s1  ;;  %s2807_s5 = sand.u32 1, %s2349_s19  }
  0x8b   : > { %1718 = vmatpush3.msra.mxu1 %v675_v5  ;;  %1707 = vmatpush3.msra.mxu0 %v588_v6  ;;  %v1645_v14 = vld [vmem:[%s2838_s4] ss:$0 sm:$0xff]  ;;  %s2596_s7 = sshll.u32 %s2349_s19, 7  ;;  %s1305_s24 = sshll.u32 %s557_s27, 4  ;;  %s1306_s24 = int_to_ptr.vmem [resolvable:$true] %s1305_s24 }
  0x8c   : > { %1719 = vmatprep.subr.mxu1 %v2241_v0  ;;  %1708 = vmatprep.subr.mxu0 %v2241_v0  ;;  %v1643_v15 = vld [vmem:[%s2839_s2] ss:$0 sm:$0xff]  ;;  %s1673_s22 = sshll.u32 %s2349_s19, 8  ;;  %s2609_s25 = scalar_lea.sflag [#allocation13], %s2807_s5 }
  0x8d   : > { %1720 = vmatpush3.msra.mxu1 %v674_v7  ;;  %1709 = vmatpush3.msra.mxu0 %v587_v8  ;;  %p2840_p7 = scmp.ne.s32.totalorder %s2827_s26, 0 }
  0x8e   : > { %1722 = vmatmul.mubr.msk.f32.vlgmr.msra.gmra.mxu1 %vm598_vm1, %v586_v9  ;;  %1711 = vmatmul.mubr.msk.f32.vlgmr.msra.gmra.mxu0 %vm598_vm1, %v586_v9 }
  0x8f   : > { %1724 = vmatprep.subr.mxu0 %v2241_v0  ;;  %1732 = vmatprep.mubr.msk.f32.mxu0 %vm2242_vm0, %v2241_v0 }
  0x90   : > { %1725 = vmatpush3.msra.mxu0 %v760_v10  ;;  %1735 = vmatprep.subr.mxu1 %v2241_v0 }
  0x91   : > { %1726 = vmatprep.subr.mxu0 %v2241_v0  ;;  %1737 = vmatprep.mubr.msk.f32.mxu1 %vm2242_vm0, %v2241_v0 }
  0x92   : > { %1727 = vmatpush3.msra.mxu0 %v759_v11 }
  0x93   : > { %1728 = vmatprep.subr.mxu0 %v2241_v0 }
  0x94   : > { %1729 = vmatpush3.msra.mxu0 %v758_v12 }
  0x95   : > { %1730 = vmatprep.subr.mxu0 %v2241_v0 }
  0x96   : > { %1731 = vmatpush3.msra.mxu0 %v757_v13 }
  0x97   : > { %1733 = vmatmul.mubr.msk.f32.vlgmr.msra.gmra.mxu0 %vm598_vm1, %v586_v9  ;;  %1755 = vmatprep.subr.mxu0 %v2241_v0 }
  0x98   : > { %1763 = vmatprep.mubr.msk.f32.mxu0 %vm2242_vm0, %v2241_v0  ;;  %1756 = vmatpush3.msra.mxu0 %v1169_v45 }
  0x99   : > { %1757 = vmatprep.subr.mxu0 %v2241_v0 }
  0x9a   : > { %1758 = vmatpush3.msra.mxu0 %v1168_v46 }
  0x9b   : > { %1759 = vmatprep.subr.mxu0 %v2241_v0 }
  0x9c   : > { %1760 = vmatpush3.msra.mxu0 %v1167_v47 }
  0x9d   : > { %1761 = vmatprep.subr.mxu0 %v2241_v0 }
  0x9e   : > { %1762 = vmatpush3.msra.mxu0 %v1166_v48 }
 0x14e   : > { %v751_v16 = vpop.f32.mrf.mxu1  ;;  %v668_v17 = vpop.f32.mrf.mxu0 }
 0x14f   : > { %v752_v18 = vadd.f32 %v1645_v14, %v751_v16  ;;  %v669_v19 = vadd.f32 %v1643_v15, %v668_v17 }
 0x150   : > { %v1723_v20 = vpop.f32.mrf.mxu1  ;;  %v1712_v21 = vpop.f32.mrf.mxu0 }
 0x151   : > { %v755_v22 = vmax.f32 %v752_v18, -128.0  ;;  %v672_v23 = vmax.f32 %v669_v19, -128.0 }
 0x153   : > { %v756_v24 = vmin.f32 %v755_v22, 127.0  ;;  %v673_v25 = vmin.f32 %v672_v23, 127.0 }
 0x155   : > { %1001 = vrot.lane.b32.xlu0 %v756_v24, %s2243_s18  ;;  %1736 = vmatpush3.xpose.msk.msra.mxu1 %vm843_vm2, %v756_v24  ;;  %841 = vst.msk [vmem:[%s557_s27] sm:$0xff] %vm598_vm1, %v756_v24  ;;  %840 = vst.msk [vmem:[%s2806_s3] sm:$0xff] %vm598_vm1, %v673_v25 }
 0x156   : > { %1740 = vmatprep.subr.mxu1 %v2241_v0 }
 0x157   : > { %v834_v27 = vpop.f32.mrf.mxu0 }
 0x158   : > { %1738 = vmatmul.mubr.msk.f32.vlgmr.msra.gmra.mxu1 %vm843_vm2, %v673_v25  ;;  %v835_v28 = vadd.f32 %v1647_v26, %v834_v27 }
 0x159   : > { %999 = vrot.lane.b32.xlu0 %v673_v25, %s2243_s18  ;;  %1742 = vmatprep.mubr.msk.f32.mxu1 %vm2242_vm0, %v2241_v0  ;;  %v1734_v29 = vpop.f32.mrf.mxu0 }
 0x15a   : > { %v838_v30 = vmax.f32 %v835_v28, -128.0 }
 0x15c   : > { %v839_v31 = vmin.f32 %v838_v30, 127.0 }
 0x15e   : > { %1082 = vrot.lane.b32.xlu1 %v839_v31, %s2243_s18  ;;  %1741 = vmatpush3.msra.mxu1 %v839_v31  ;;  %842 = vst.msk [vmem:[%s2805_s23] sm:$0xff] %vm598_vm1, %v839_v31  ;;  %s2602_s18 = scalar_lea.hbm %s2788_s10, %s2596_s7 }
 0x15f   : > { %1745 = vmatprep.subr.mxu1 %v2241_v0 }
 0x1c7   : > { %v1002_v34 = vpop.permute.xlu0 %1001 }
 0x1cb   : > { %v1000_v38 = vpop.permute.xlu0 %999 }
 0x1d0   : > { %v1083_v37 = vpop.permute.xlu1 %1082 }
 0x218   : > { %v916_v32 = vpop.f32.mrf.mxu1 }
 0x219   : > { %v920_v33 = vmax.f32 %v916_v32, -128.0 }
 0x21a   : > { %v1739_v35 = vpop.f32.mrf.mxu1 }
 0x21b   : > { %v921_v36 = vmin.f32 %v920_v33, 127.0 }
 0x21d   : > { %923 = vst.msk [vmem:[%s2570_s28] sm:$0xff] %vm922_vm3, %v921_v36  ;;  %1743 = vmatmul.mubr.msk.f32.vlgmr.msra.gmra.mxu1 %vm922_vm3, %v921_v36 }
 0x21e   : > { %1746 = vmatpush3.xpose.msk.msra.mxu1 %vm843_vm2, %v1002_v34  ;;  %1747 = vmatprep.mubr.msk.f32.mxu1 %vm2242_vm0, %v2241_v0 }
 0x21f   : > { %1750 = vmatprep.subr.mxu1 %v2241_v0 }
 0x221   : > { %1748 = vmatmul.mubr.msk.f32.vlgmr.msra.gmra.mxu1 %vm843_vm2, %v1000_v38 }
 0x222   : > { %1751 = vmatpush3.msra.mxu1 %v1083_v37  ;;  %1752 = vmatprep.mubr.msk.f32.mxu1 %vm2242_vm0, %v2241_v0 }
 0x2dd   : > { %v993_v39 = vpop.f32.mrf.mxu1 }
 0x2de   : > { %v997_v53 = vmax.f32 %v993_v39, -128.0 }
 0x2df   : > { %v1744_v40 = vpop.f32.mrf.mxu1 }
 0x2e0   : > { %v998_v54 = vmin.f32 %v997_v53, 127.0 }
 0x2e1   : > { %v1073_v41 = vpop.f32.mrf.mxu1 }
 0x2e2   : > { %v1077_v42 = vmax.f32 %v1073_v41, -128.0 }
 0x2e3   : > { %v1749_v43 = vpop.f32.mrf.mxu1 }
 0x2e4   : > { %v1078_v44 = vmin.f32 %v1077_v42, 127.0 }
 0x2e6   : > { %1654 = vst.msk [vmem:[%s2570_s28 + $0x8] sm:$0xff] %vm922_vm3, %v1078_v44  ;;  %1753 = vmatmul.mubr.msk.f32.vlgmr.msra.gmra.mxu1 %vm922_vm3, %v1078_v44 }
 0x3a6   : > { %v1154_v49 = vpop.f32.mrf.mxu1 }
 0x3a7   : > { %v1158_v50 = vmax.f32 %v1154_v49, -128.0 }
 0x3a8   : > { %v1754_v51 = vpop.f32.mrf.mxu1 }
 0x3a9   : > { %v1159_v52 = vmin.f32 %v1158_v50, 127.0 }
 0x3ab   : > { %1161 = vrot.lane.b32.xlu1 %v1159_v52, %s2244_s16  ;;  %s2018_s16 = scalar_lea.vmem %s1306_s24, 128 }
 0x3ac   : > { %p2019_p8 = scmp.ne.s32.totalorder %s1306_s24, %s2018_s16 }
 0x3ae   : > { %p2020_p10 = pnand %p2019_p8, %p2840_p7 }
 0x3b0   : > { %p2021_p0 = pneg %p2020_p10 }
 0x41d   : > { %v1162_v55 = vpop.permute.xlu1 %1161 }
 0x41e   : > { %v1164_v56 = vsel %vm843_vm2, %v998_v54, %v1162_v55 }
 0x41f   : > { %1165 = vst.msk [vmem:[%s2804_s17] sm:$0xff] %vm598_vm1, %v1164_v56  ;;  %1764 = vmatmul.mubr.msk.f32.vlgmr.msra.gmra.mxu0 %vm598_vm1, %v1164_v56  ;;  %s2245_s17 = smov [#allocation12]  }
 0x420   : > { %s2022_s23 = sshll.u32 %s2245_s17, 4  ;;  %s2023_s23 = int_to_ptr.vmem [resolvable:$false] %s2022_s23 }
 0x421   : > { %s2024_s3 = scalar_lea.vmem %s2023_s23, 256  ;;  %p2025_p12 = scmp.lt.s32.totalorder %s1306_s24, %s2023_s23 }
 0x422   : > { %p2026_p2 = scmp.lt.s32.totalorder %s2024_s3, %s2018_s16 }
 0x424   : > { %p2027_p9 = por %p2026_p2, %p2025_p12 }
 0x426   : > { %p2028_p11 = pnand %p2027_p9, %p2021_p0 }
 0x428   : > { %2031 = shalt.err (!%p2028_p11)
}
 0x429   : > { %s2032_s27 = scalar_lea.hbm %s2602_s18, 128  ;;  %s2036_s17 = scalar_lea.hbm %s2788_s10, 256 }
 0x42a   : > { %p2033_p13 = scmp.ne.s32.totalorder %s2602_s18, %s2032_s27  ;;  %p2037_p4 = scmp.lt.s32.totalorder %s2602_s18, %s2788_s10 }
 0x42b   : > { %p2038_p6 = scmp.lt.s32.totalorder %s2036_s17, %s2032_s27 }
 0x42c   : > { %p2034_p1 = pnand %p2033_p13, %p2840_p7 }
 0x42d   : > { %p2039_p5 = por %p2038_p6, %p2037_p4 }
 0x42e   : > { %p2035_p3 = pneg %p2034_p1 }
 0x430   : > { %p2040_p8 = pnand %p2039_p5, %p2035_p3 }
 0x432   : > { %2043 = shalt.err (!%p2040_p8)
}
 0x433   : > { %1785 = dma.vmem_to_hbm [thread:$0]  (%p2840_p7), %s1306_s24, 128, %s2602_s18, %s2609_s25  }
 0x434   : > { %s2631_s16 = scalar_lea.hbm %s2790_s12, %s1673_s22  ;;  %s1331_s15 = sshll.u32 %s2570_s28, 4  ;;  %s2634_s15 = int_to_ptr.vmem [resolvable:$true] %s1331_s15 }
 0x435   : > { %s2841_s0 = sand.u32 1, %s2349_s19   ;;  %s2044_s27 = scalar_lea.vmem %s2634_s15, 256 }
 0x436   : > { %s2638_s5 = scalar_lea.sflag [#allocation16], %s2841_s0  ;;  %p2045_p10 = scmp.ne.s32.totalorder %s2634_s15, %s2044_s27 }
 0x437   : > { %s2246_s18 = smov [#allocation15]  }
 0x438   : > { %p2046_p0 = pnand %p2045_p10, %p2840_p7  ;;  %s2048_s24 = sshll.u32 %s2246_s18, 4  ;;  %s2049_s24 = int_to_ptr.vmem [resolvable:$false] %s2048_s24 }
 0x439   : > { %s2050_s20 = scalar_lea.vmem %s2049_s24, 512  ;;  %p2051_p2 = scmp.lt.s32.totalorder %s2634_s15, %s2049_s24 }
 0x43a   : > { %p2047_p12 = pneg %p2046_p0  ;;  %p2052_p9 = scmp.lt.s32.totalorder %s2050_s20, %s2044_s27 }
 0x43c   : > { %p2053_p11 = por %p2052_p9, %p2051_p2 }
 0x43e   : > { %p2054_p13 = pnand %p2053_p11, %p2047_p12 }
 0x440   : > { %2057 = shalt.err (!%p2054_p13)
}
 0x441   : > { %s2058_s19 = scalar_lea.hbm %s2631_s16, 256  ;;  %s2062_s17 = scalar_lea.hbm %s2790_s12, 512 }
 0x442   : > { %p2059_p1 = scmp.ne.s32.totalorder %s2631_s16, %s2058_s19  ;;  %p2063_p6 = scmp.lt.s32.totalorder %s2631_s16, %s2790_s12 }
 0x443   : > { %p2064_p5 = scmp.lt.s32.totalorder %s2062_s17, %s2058_s19 }
 0x444   : > { %p2060_p3 = pnand %p2059_p1, %p2840_p7 }
 0x445   : > { %p2065_p8 = por %p2064_p5, %p2063_p6 }
 0x446   : > { %p2061_p4 = pneg %p2060_p3 }
 0x448   : > { %p2066_p10 = pnand %p2065_p8, %p2061_p4 }
 0x44a   : > { %2069 = shalt.err (!%p2066_p10)
}
 0x44b   : > { %s2247_s0 = smov 128   ;;  %s2248_s27 = smov 8  }
 0x44c   : > { %1787 = dma.vmem_to_hbm [thread:$0]  (%p2840_p7), %s2634_s15, 256, %s2631_s16, %s2638_s5, %s2247_s0, %s2247_s0, %s2248_s27  }
 0x44d   : > { %s2665_s20 = scalar_lea.hbm %s2787_s9, %s2596_s7  ;;  %s2842_s19 = scalar_lea.vmem [#allocation11], %s2497_s1 }
 0x44e   : > { %s1292_s28 = sshll.u32 %s2842_s19, 4  ;;  %s2673_s3 = scalar_lea.hbm %s2789_s11, %s2596_s7  ;;  %s1293_s28 = int_to_ptr.vmem [resolvable:$true] %s1292_s28 }
 0x44f   : > { %s1254_s23 = scalar_lea.sflag [#allocation4], %s2494_s21  ;;  %s2070_s2 = scalar_lea.vmem %s1293_s28, 128 }
 0x450   : > { %p2071_p0 = scmp.ne.s32.totalorder %s1293_s28, %s2070_s2  ;;  %s2249_s16 = smov [#allocation11]  }
 0x451   : > { %s2074_s15 = sshll.u32 %s2249_s16, 4  ;;  %s2075_s15 = int_to_ptr.vmem [resolvable:$false] %s2074_s15 }
 0x452   : > { %p2072_p12 = pnand %p2071_p0, %p2840_p7  ;;  %s2076_s0 = scalar_lea.vmem %s2075_s15, 256 }
 0x453   : > { %p2077_p9 = scmp.lt.s32.totalorder %s1293_s28, %s2075_s15  ;;  %p2078_p11 = scmp.lt.s32.totalorder %s2076_s0, %s2070_s2 }
 0x454   : > { %p2073_p2 = pneg %p2072_p12 }
 0x455   : > { %p2079_p13 = por %p2078_p11, %p2077_p9 }
 0x457   : > { %p2080_p1 = pnand %p2079_p13, %p2073_p2 }
 0x459   : > { %2083 = shalt.err (!%p2080_p1)
}
 0x45a   : > { %s2084_s27 = scalar_lea.hbm %s2665_s20, 128  ;;  %s2088_s19 = scalar_lea.hbm %s2787_s9, 256 }
 0x45b   : > { %p2085_p3 = scmp.ne.s32.totalorder %s2665_s20, %s2084_s27  ;;  %p2089_p5 = scmp.lt.s32.totalorder %s2665_s20, %s2787_s9 }
 0x45c   : > { %p2090_p8 = scmp.lt.s32.totalorder %s2088_s19, %s2084_s27 }
 0x45d   : > { %p2086_p4 = pnand %p2085_p3, %p2840_p7 }
 0x45e   : > { %p2091_p10 = por %p2090_p8, %p2089_p5 }
 0x45f   : > { %p2087_p6 = pneg %p2086_p4 }
 0x461   : > { %p2092_p0 = pnand %p2091_p10, %p2087_p6 }
 0x463   : > { %2095 = shalt.err (!%p2092_p0)
}
 0x464   : > { %1784 = dma.vmem_to_hbm [thread:$0]  (%p2840_p7), %s1293_s28, 128, %s2665_s20, %s1254_s23  }
 0x465   : > { %s2843_s2 = scalar_lea.vmem [#allocation14], %s2497_s1  ;;  %s2698_s18 = scalar_lea.hbm %s2791_s13, %s2596_s7 }
 0x466   : > { %s1318_s16 = sshll.u32 %s2843_s2, 4  ;;  %s2844_s27 = scalar_lea.vmem [#allocation17], %s2497_s1  ;;  %s1319_s16 = int_to_ptr.vmem [resolvable:$true] %s1318_s16 }
 0x467   : > { %s1347_s24 = sshll.u32 %s2844_s27, 4  ;;  %s2096_s19 = scalar_lea.vmem %s1319_s16, 128  ;;  %s1348_s24 = int_to_ptr.vmem [resolvable:$true] %s1347_s24 }
 0x468   : > { %p2097_p12 = scmp.ne.s32.totalorder %s1319_s16, %s2096_s19  ;;  %s2250_s22 = smov [#allocation14]  }
 0x469   : > { %s2100_s17 = sshll.u32 %s2250_s22, 4  ;;  %s2101_s17 = int_to_ptr.vmem [resolvable:$false] %s2100_s17 }
 0x46a   : > { %p2098_p2 = pnand %p2097_p12, %p2840_p7  ;;  %s2102_s4 = scalar_lea.vmem %s2101_s17, 256 }
 0x46b   : > { %p2103_p11 = scmp.lt.s32.totalorder %s1319_s16, %s2101_s17  ;;  %p2104_p13 = scmp.lt.s32.totalorder %s2102_s4, %s2096_s19 }
 0x46c   : > { %p2099_p9 = pneg %p2098_p2 }
 0x46d   : > { %p2105_p1 = por %p2104_p13, %p2103_p11 }
 0x46f   : > { %p2106_p3 = pnand %p2105_p1, %p2099_p9 }
 0x471   : > { %2109 = shalt.err (!%p2106_p3)
}
 0x472   : > { %s2110_s20 = scalar_lea.hbm %s2673_s3, 128  ;;  %s2114_s2 = scalar_lea.hbm %s2789_s11, 256 }
 0x473   : > { %p2111_p4 = scmp.ne.s32.totalorder %s2673_s3, %s2110_s20  ;;  %p2115_p8 = scmp.lt.s32.totalorder %s2673_s3, %s2789_s11 }
 0x474   : > { %p2116_p10 = scmp.lt.s32.totalorder %s2114_s2, %s2110_s20 }
 0x475   : > { %p2112_p6 = pnand %p2111_p4, %p2840_p7 }
 0x476   : > { %p2117_p0 = por %p2116_p10, %p2115_p8 }
 0x477   : > { %p2113_p5 = pneg %p2112_p6 }
 0x479   : > { %p2118_p12 = pnand %p2117_p0, %p2113_p5 }
 0x47b   : > { %2121 = shalt.err (!%p2118_p12)
}
 0x47c   : > { %1786 = dma.vmem_to_hbm [thread:$0]  (%p2840_p7), %s1319_s16, 128, %s2673_s3, %s2609_s25  }
 0x47d   : > { %s2122_s4 = scalar_lea.vmem %s1348_s24, 128  ;;  %s2251_s27 = smov [#allocation17]  }
 0x47e   : > { %p2123_p2 = scmp.ne.s32.totalorder %s1348_s24, %s2122_s4  ;;  %s2126_s19 = sshll.u32 %s2251_s27, 4  ;;  %s2127_s19 = int_to_ptr.vmem [resolvable:$false] %s2126_s19 }
 0x47f   : > { %s2128_s22 = scalar_lea.vmem %s2127_s19, 256  ;;  %p2129_p13 = scmp.lt.s32.totalorder %s1348_s24, %s2127_s19 }
 0x480   : > { %p2124_p9 = pnand %p2123_p2, %p2840_p7  ;;  %p2130_p1 = scmp.lt.s32.totalorder %s2128_s22, %s2122_s4 }
 0x482   : > { %p2125_p11 = pneg %p2124_p9  ;;  %p2131_p3 = por %p2130_p1, %p2129_p13 }
 0x484   : > { %p2132_p4 = pnand %p2131_p3, %p2125_p11 }
 0x486   : > { %2135 = shalt.err (!%p2132_p4)
}
 0x487   : > { %s2136_s25 = scalar_lea.hbm %s2698_s18, 128  ;;  %s2140_s17 = scalar_lea.hbm %s2791_s13, 256 }
 0x488   : > { %p2137_p6 = scmp.ne.s32.totalorder %s2698_s18, %s2136_s25  ;;  %p2141_p10 = scmp.lt.s32.totalorder %s2698_s18, %s2791_s13 }
 0x489   : > { %p2142_p0 = scmp.lt.s32.totalorder %s2140_s17, %s2136_s25 }
 0x48a   : > { %p2138_p5 = pnand %p2137_p6, %p2840_p7 }
 0x48b   : > { %p2143_p12 = por %p2142_p0, %p2141_p10 }
 0x48c   : > { %p2139_p8 = pneg %p2138_p5 }
 0x48e   : > { %p2144_p2 = pnand %p2143_p12, %p2139_p8 }
 0x490   : > { %2147 = shalt.err (!%p2144_p2)
}
 0x491   : > { %1788 = dma.vmem_to_hbm [thread:$0]  (%p2840_p7), %s1348_s24, 128, %s2698_s18, %s2638_s5   ;;  %v1656_v57 = vld [vmem:[%s2786_s8] ss:$0 sm:$0xff] }
 0x492   : > { %s585_s15 = scalar_lea.vmem [#allocation18], %s2497_s1  ;;  %s1358_s19 = scalar_lea.hbm %s2792_s14, %s2596_s7 }
 0x493   : > { %s1360_s0 = sshll.u32 %s585_s15, 4  ;;  %s1279_s22 = scalar_lea.sflag [#allocation19], %s2494_s21  ;;  %s1361_s0 = int_to_ptr.vmem [resolvable:$true] %s1360_s0 }
 0x494   : > { %s2148_s5 = scalar_lea.vmem %s1361_s0, 128  ;;  %s2252_s18 = smov [#allocation18]  }
 0x495   : > { %p2149_p9 = scmp.ne.s32.totalorder %s1361_s0, %s2148_s5  ;;  %s2152_s24 = sshll.u32 %s2252_s18, 4  ;;  %s2153_s24 = int_to_ptr.vmem [resolvable:$false] %s2152_s24 }
 0x496   : > { %s2154_s1 = scalar_lea.vmem %s2153_s24, 256  ;;  %p2155_p1 = scmp.lt.s32.totalorder %s1361_s0, %s2153_s24 }
 0x497   : > { %p2150_p11 = pnand %p2149_p9, %p2840_p7  ;;  %p2156_p3 = scmp.lt.s32.totalorder %s2154_s1, %s2148_s5 }
 0x499   : > { %p2151_p13 = pneg %p2150_p11  ;;  %p2157_p4 = por %p2156_p3, %p2155_p1 }
 0x49b   : > { %p2158_p6 = pnand %p2157_p4, %p2151_p13 }
 0x4df   : > { %v1246_v58 = vpop.f32.mrf.mxu0 }
 0x4e0   : > { %v1247_v59 = vadd.f32 %v1656_v57, %v1246_v58 }
 0x4e1   : > { %v1765_v60 = vpop.f32.mrf.mxu0 }
 0x4e2   : > { %v1250_v61 = vmax.f32 %v1247_v59, -128.0 }
 0x4e4   : > { %v1251_v62 = vmin.f32 %v1250_v61, 127.0 }
 0x4e6   : > { %1252 = vst.msk [vmem:[%s585_s15] sm:$0xff] %vm598_vm1, %v1251_v62 }
 0x4e7   : > { %2161 = shalt.err (!%p2158_p6)
}
 0x4e8   : > { %s2162_s25 = scalar_lea.hbm %s1358_s19, 128  ;;  %s2166_s3 = scalar_lea.hbm %s2792_s14, 256 }
 0x4e9   : > { %p2163_p5 = scmp.ne.s32.totalorder %s1358_s19, %s2162_s25  ;;  %p2167_p0 = scmp.lt.s32.totalorder %s1358_s19, %s2792_s14 }
 0x4ea   : > { %p2168_p12 = scmp.lt.s32.totalorder %s2166_s3, %s2162_s25 }
 0x4eb   : > { %p2164_p8 = pnand %p2163_p5, %p2840_p7 }
 0x4ec   : > { %p2169_p2 = por %p2168_p12, %p2167_p0 }
 0x4ed   : > { %p2165_p10 = pneg %p2164_p8 }
 0x4ef   : > { %p2170_p9 = pnand %p2169_p2, %p2165_p10 }
 0x4f1   : > { %2173 = shalt.err (!%p2170_p9)
}
 0x4f2   : > { %1789 = dma.vmem_to_hbm [thread:$0]  (%p2840_p7), %s1361_s0, 128, %s1358_s19, %s1279_s22  }
 0x4f3 PF: > { %s2845_s20 = sld [smem:[#allocation31_spill]]  ;;  %s1372_s23 = sand.u32 1, %s2220_s29  }
 0x4f4   : > { %s2846_s28 = sld [smem:[#allocation28_spill]]  ;;  %s1373_s2 = scalar_lea.sflag [#allocation4], %s1372_s23 }
 0x4f9   : > { %p2847_p11 = scmp.ne.s32.totalorder %s2845_s20, 0 }
 0x4fa   : > { %p2848_p13 = scmp.ge.s32.totalorder %s2846_s28, 2 }
 0x4fc   : > { %p1814_p1 = pnand %p2848_p13, %p2847_p11 }
 0x4fe   : > { %p1815_p3 = pneg %p1814_p1 }
 0x500   : > { %2203 = dma.done.wait (%p1815_p3), %s1373_s2, 128  }
 0x501   : > { %2205 = vsyncadd (%p1815_p3), %s1373_s2, 4294967168  ;;  %s2849_s15 = sadd.s32 4294967294, %s2846_s28  }
 0x502   : > { %s1381_s4 = sand.u32 1, %s2849_s15  }
 0x503   : > { %s1382_s27 = scalar_lea.sflag [#allocation13], %s1381_s4 }
 0x504   : > { %2207 = dma.done.wait (%p1815_p3), %s1382_s27, 256  }
 0x505   : > { %2209 = vsyncadd (%p1815_p3), %s1382_s27, 4294967040  ;;  %s1400_s26 = scalar_lea.sflag [#allocation16], %s1381_s4 }
 0x506   : > { %2211 = dma.done.wait (%p1815_p3), %s1400_s26, 384  }
 0x507   : > { %2213 = vsyncadd (%p1815_p3), %s1400_s26, 4294966912  ;;  %s1418_s0 = scalar_lea.sflag [#allocation19], %s1372_s23 }
 0x508   : > { %2215 = dma.done.wait (%p1815_p3), %s1418_s0, 128  }
 0x509   : > { %2217 = vsyncadd (%p1815_p3), %s1418_s0, 4294967168  ;;  %s2850_s16 = sld [smem:[#allocation29_spill]]  ;;  %s2853_s29 = smov %s2224_s30 }
 0x50a   : > { %s2851_s19 = sld [smem:[#allocation27_spill]] }
 0x50b   : > { %s2852_s15 = sld [smem:[#allocation30_spill]] }
 0x50f   : > { %p39_p7 = scmp.ge.s32.totalorder %s2850_s16, 4  }
 0x510   : > { %s2854_s30 = smov %s2851_s19 }
 0x511   :  { %41 = sbr.rel (!%p39_p7) target bundleno = 21 (0x15), region = 199 }
 0x516   :  { %1423 = vsyncpa [#allocation3], 1 }
 0x517   :  { %1425 = vsyncpa [#allocation3 + $0x1], 1 }
 0x518   :  { %1426 = vsyncpa [#allocation6], 1 }
 0x519   :  { %1427 = vsyncpa [#allocation9], 1 }
 0x51a   :  { %1428 = vsyncpa [#allocation4], 1 }
 0x51b   :  { %1430 = vsyncpa [#allocation4 + $0x1], 1 }
 0x51c   :  { %1431 = vsyncpa [#allocation13], 1 }
 0x51d   :  { %1433 = vsyncpa [#allocation13 + $0x1], 1 }
 0x51e   :  { %1434 = vsyncpa [#allocation16], 1 }
 0x51f   :  { %1436 = vsyncpa [#allocation16 + $0x1], 1 }
 0x520   :  { %1437 = vsyncpa [#allocation19], 1 }
 0x521   :  { %1439 = vsyncpa [#allocation19 + $0x1], 1 }

</bundles_post_ra>
